<compile_context>
chip_gen: v5e
topology: v5e:2x2
jax: 0.10.0
libtpu: 0.0.40
codegen_flags: <defaults>
</compile_context>

<pallas_src>
import jax
import jax.numpy as jnp
from jax.experimental import pallas as pl
from jax.experimental.pallas import tpu as pltpu


# ---------------------------------------------------------------------------
# Fused kernel: 3 x (A_hat @ H @ W + b, ReLU), activation kept in VMEM scratch.
# ---------------------------------------------------------------------------
def _gcn_fused_kernel(a_ref, x_ref, w_ref, b_ref, o_ref, h_ref):
    """
    a_ref: [N, N]      bf16 normalized adjacency (D^-1/2 A D^-1/2)
    x_ref: [N, Fp]     f32 node features (feature axis zero-padded to Fp lanes)
    w_ref: [L, Fp, Fp] bf16 stacked layer weights (zero-padded)
    b_ref: [L, 1, Fp]  f32 stacked layer biases (zero-padded)
    o_ref: [N, Fp]     f32 output features
    h_ref: [N, Fp]     f32 VMEM scratch holding the inter-layer activation
    """
    a = a_ref[...]                       # bf16, loaded once, reused by all layers
    h_ref[...] = x_ref[...]              # layer-0 input

    num_layers = w_ref.shape[0]          # static (3)
    for l in range(num_layers):          # fully unrolled: tiny fixed trip count
        # Aggregate neighbor features on the MXU: A_hat @ H   (bf16 in, f32 acc)
        agg = jnp.dot(
            a,
            h_ref[...].astype(jnp.bfloat16),
            preferred_element_type=jnp.float32,
        )
        # Linear transform: (A_hat H) W                        (bf16 in, f32 acc)
        hw = jnp.dot(
            agg.astype(jnp.bfloat16),
            w_ref[l],
            preferred_element_type=jnp.float32,
        )
        # Bias + ReLU in f32 on the VPU; write back to VMEM scratch.
        h_ref[...] = jnp.maximum(hw + b_ref[l], 0.0)

    o_ref[...] = h_ref[...].astype(o_ref.dtype)


def normalize_adjacency(adj):
    """DGL norm='both': D_in^{-1/2} A D_out^{-1/2}, degrees clamped to >= 1."""
    deg_out = jnp.clip(adj.sum(axis=0), 1.0, None)  # out-degree of src (cols)
    deg_in = jnp.clip(adj.sum(axis=1), 1.0, None)   # in-degree of dst (rows)
    d_in = jax.lax.rsqrt(deg_in)[:, None]
    d_out = jax.lax.rsqrt(deg_out)[None, :]
    return (adj * d_in) * d_out


@jax.jit
def gcn_forward(adj, x, params):
    """Full GCN forward (3 GraphConv+ReLU layers) in one Pallas call."""
    N, F = x.shape
    L = len(params)
    Fp = max(128, ((F + 127) // 128) * 128)  # lane-dense feature width

    # One-time glue in plain JAX: normalize adjacency, cast MXU operands to
    # bf16, zero-pad the feature axis to Fp lanes. Zero W rows/cols and zero
    # bias keep the padded lanes exactly 0 through ReLU in every layer.
    a_hat = normalize_adjacency(adj).astype(jnp.bfloat16)

    x_p = jnp.zeros((N, Fp), jnp.float32).at[:, :F].set(x)
    w_p = jnp.zeros((L, Fp, Fp), jnp.bfloat16)
    b_p = jnp.zeros((L, 1, Fp), jnp.float32)
    for l, (w, b) in enumerate(params):
        w_p = w_p.at[l, :F, :F].set(w.astype(jnp.bfloat16))
        b_p = b_p.at[l, 0, :F].set(b)

    out_p = pl.pallas_call(
        _gcn_fused_kernel,
        out_shape=jax.ShapeDtypeStruct((N, Fp), jnp.float32),
        # No grid: everything is resident in VMEM for a single invocation, so
        # the pipeliner does not allocate pointless double buffers.
        in_specs=[
            pl.BlockSpec(memory_space=pltpu.MemorySpace.VMEM),  # a_hat
            pl.BlockSpec(memory_space=pltpu.MemorySpace.VMEM),  # x (padded)
            pl.BlockSpec(memory_space=pltpu.MemorySpace.VMEM),  # stacked W
            pl.BlockSpec(memory_space=pltpu.MemorySpace.VMEM),  # stacked b
        ],
        out_specs=pl.BlockSpec(memory_space=pltpu.MemorySpace.VMEM),
        scratch_shapes=[pltpu.VMEM((N, Fp), jnp.float32)],  # inter-layer H
        compiler_params=pltpu.CompilerParams(
            vmem_limit_bytes=64 * 1024 * 1024,  # explicit ceiling (v5e default is 16 MiB)
        ),
    )(a_hat, x_p, w_p, b_p)

    return out_p[:, :F]


def init_params(key, num_feats, num_layers=3):
    """Deterministic xavier-uniform weights, zero biases (matches GraphConv init)."""
    params = []
    for i in range(num_layers):
        k = jax.random.fold_in(key, i)
        limit = jnp.sqrt(6.0 / (num_feats + num_feats))
        w = jax.random.uniform(
            k, (num_feats, num_feats), jnp.float32, -limit, limit
        )
        b = jnp.zeros((num_feats,), jnp.float32)
        params.append((w, b))
    return params


if __name__ == "__main__":
    key = jax.random.PRNGKey(0)
    N = 64          # number of graph nodes
    F = 32          # num_feats

    k_adj, k_x, k_p = jax.random.split(key, 3)

    # Random symmetric binary adjacency with self-loops.
    logits = jax.random.uniform(k_adj, (N, N))
    adj = (logits + logits.T > 1.2).astype(jnp.float32)
    adj = jnp.maximum(adj, jnp.eye(N, dtype=jnp.float32))

    x = jax.random.normal(k_x, (N, F), jnp.float32)
    params = init_params(k_p, F)

    out = gcn_forward(adj, x, params)
    jax.block_until_ready(out)
    assert out.shape == (N, F)

    # Reference 1: pure-JAX with the same bf16 MXU casts (tight check).
    a_hat_f32 = normalize_adjacency(adj)
    a_bf = a_hat_f32.astype(jnp.bfloat16)
    h_bf_ref = x
    for (w, b) in params:
        agg = jnp.dot(a_bf, h_bf_ref.astype(jnp.bfloat16),
                      preferred_element_type=jnp.float32)
        h_bf_ref = jnp.maximum(
            jnp.dot(agg.astype(jnp.bfloat16), w.astype(jnp.bfloat16),
                    preferred_element_type=jnp.float32) + b[None, :],
            0.0,
        )
    assert jnp.allclose(out, h_bf_ref, atol=1e-2, rtol=1e-2)

    # Reference 2: full-f32 math (loose check — kernel uses bf16 MXU inputs).
    h32 = x
    for (w, b) in params:
        h32 = jnp.maximum(a_hat_f32 @ h32 @ w + b[None, :], 0.0)
    assert jnp.allclose(out, h32, atol=6e-2, rtol=6e-2)

    print("KERNEL_OK")
</pallas_src>

<mosaic_0001>
module attributes {stable_mosaic.version = 11 : i64} {
  func.func @_gcn_fused_kernel(%arg0: memref<64x64xbf16, #tpu.memory_space<vmem>>, %arg1: memref<64x128xf32, #tpu.memory_space<vmem>>, %arg2: memref<3x128x128xbf16, #tpu.memory_space<vmem>>, %arg3: memref<3x1x128xf32, #tpu.memory_space<vmem>>, %arg4: memref<64x128xf32, #tpu.memory_space<vmem>>, %arg5: memref<64x128xf32, #tpu.memory_space<vmem>>) attributes {dimension_semantics = [], scalar_prefetch = 0 : i64, scratch_operands = 1 : i64, tpu.core_type = #tpu.core_type<tc>} {
    %c0 = arith.constant 0 : index
    %c0_0 = arith.constant 0 : index
    %0 = vector.load %arg0[%c0, %c0_0] : memref<64x64xbf16, #tpu.memory_space<vmem>>, vector<64x64xbf16>
    %c0_1 = arith.constant 0 : index
    %c0_2 = arith.constant 0 : index
    %1 = vector.load %arg1[%c0_1, %c0_2] : memref<64x128xf32, #tpu.memory_space<vmem>>, vector<64x128xf32>
    %c0_3 = arith.constant 0 : index
    %c0_4 = arith.constant 0 : index
    %2 = vector.load %arg5[%c0_3, %c0_4] : memref<64x128xf32, #tpu.memory_space<vmem>>, vector<64x128xf32>
    tpu.vector_store %arg5[%c0_3, %c0_4], %1 {strides = array<i32>} : memref<64x128xf32, #tpu.memory_space<vmem>>, vector<64x128xf32>,
    %c0_5 = arith.constant 0 : index
    %c0_6 = arith.constant 0 : index
    %3 = vector.load %arg5[%c0_5, %c0_6] : memref<64x128xf32, #tpu.memory_space<vmem>>, vector<64x128xf32>
    %4 = arith.truncf %3 : vector<64x128xf32> to vector<64x128xbf16>
    %cst = arith.constant dense<0.000000e+00> : vector<64x128xf32>
    %5 = tpu.matmul %0, %4, %cst {dimension_numbers = #tpu.dot_dimension_numbers<[1], [0], [0], [1], [0, 0, 1, 1], [], []>} : vector<64x64xbf16>, vector<64x128xbf16>, vector<64x128xf32> -> vector<64x128xf32>
    %6 = arith.truncf %5 : vector<64x128xf32> to vector<64x128xbf16>
    %c0_7 = arith.constant 0 : index
    %c0_8 = arith.constant 0 : index
    %c0_9 = arith.constant 0 : index
    %7 = vector.load %arg2[%c0_7, %c0_8, %c0_9] : memref<3x128x128xbf16, #tpu.memory_space<vmem>>, vector<1x128x128xbf16>
    %8 = vector.shape_cast %7 : vector<1x128x128xbf16> to vector<128x128xbf16>
    %cst_10 = arith.constant dense<0.000000e+00> : vector<64x128xf32>
    %9 = tpu.matmul %6, %8, %cst_10 {dimension_numbers = #tpu.dot_dimension_numbers<[1], [0], [0], [1], [0, 0, 1, 1], [], []>} : vector<64x128xbf16>, vector<128x128xbf16>, vector<64x128xf32> -> vector<64x128xf32>
    %c0_11 = arith.constant 0 : index
    %c0_12 = arith.constant 0 : index
    %c0_13 = arith.constant 0 : index
    %10 = vector.load %arg3[%c0_11, %c0_12, %c0_13] : memref<3x1x128xf32, #tpu.memory_space<vmem>>, vector<1x1x128xf32>
    %11 = vector.shape_cast %10 : vector<1x1x128xf32> to vector<1x128xf32>
    %12 = vector.broadcast %11 : vector<1x128xf32> to vector<64x128xf32>
    %13 = arith.addf %9, %12 : vector<64x128xf32>
    %cst_14 = arith.constant 0.000000e+00 : f32
    %14 = vector.broadcast %cst_14 : f32 to vector<64x128xf32>
    %15 = arith.maximumf %13, %14 : vector<64x128xf32>
    %c0_15 = arith.constant 0 : index
    %c0_16 = arith.constant 0 : index
    %16 = vector.load %arg5[%c0_15, %c0_16] : memref<64x128xf32, #tpu.memory_space<vmem>>, vector<64x128xf32>
    tpu.vector_store %arg5[%c0_15, %c0_16], %15 {strides = array<i32>} : memref<64x128xf32, #tpu.memory_space<vmem>>, vector<64x128xf32>,
    %c0_17 = arith.constant 0 : index
    %c0_18 = arith.constant 0 : index
    %17 = vector.load %arg5[%c0_17, %c0_18] : memref<64x128xf32, #tpu.memory_space<vmem>>, vector<64x128xf32>
    %18 = arith.truncf %17 : vector<64x128xf32> to vector<64x128xbf16>
    %cst_19 = arith.constant dense<0.000000e+00> : vector<64x128xf32>
    %19 = tpu.matmul %0, %18, %cst_19 {dimension_numbers = #tpu.dot_dimension_numbers<[1], [0], [0], [1], [0, 0, 1, 1], [], []>} : vector<64x64xbf16>, vector<64x128xbf16>, vector<64x128xf32> -> vector<64x128xf32>
    %20 = arith.truncf %19 : vector<64x128xf32> to vector<64x128xbf16>
    %c1 = arith.constant 1 : index
    %c0_20 = arith.constant 0 : index
    %c0_21 = arith.constant 0 : index
    %21 = vector.load %arg2[%c1, %c0_20, %c0_21] : memref<3x128x128xbf16, #tpu.memory_space<vmem>>, vector<1x128x128xbf16>
    %22 = vector.shape_cast %21 : vector<1x128x128xbf16> to vector<128x128xbf16>
    %cst_22 = arith.constant dense<0.000000e+00> : vector<64x128xf32>
    %23 = tpu.matmul %20, %22, %cst_22 {dimension_numbers = #tpu.dot_dimension_numbers<[1], [0], [0], [1], [0, 0, 1, 1], [], []>} : vector<64x128xbf16>, vector<128x128xbf16>, vector<64x128xf32> -> vector<64x128xf32>
    %c1_23 = arith.constant 1 : index
    %c0_24 = arith.constant 0 : index
    %c0_25 = arith.constant 0 : index
    %24 = vector.load %arg3[%c1_23, %c0_24, %c0_25] : memref<3x1x128xf32, #tpu.memory_space<vmem>>, vector<1x1x128xf32>
    %25 = vector.shape_cast %24 : vector<1x1x128xf32> to vector<1x128xf32>
    %26 = vector.broadcast %25 : vector<1x128xf32> to vector<64x128xf32>
    %27 = arith.addf %23, %26 : vector<64x128xf32>
    %cst_26 = arith.constant 0.000000e+00 : f32
    %28 = vector.broadcast %cst_26 : f32 to vector<64x128xf32>
    %29 = arith.maximumf %27, %28 : vector<64x128xf32>
    %c0_27 = arith.constant 0 : index
    %c0_28 = arith.constant 0 : index
    %30 = vector.load %arg5[%c0_27, %c0_28] : memref<64x128xf32, #tpu.memory_space<vmem>>, vector<64x128xf32>
    tpu.vector_store %arg5[%c0_27, %c0_28], %29 {strides = array<i32>} : memref<64x128xf32, #tpu.memory_space<vmem>>, vector<64x128xf32>,
    %c0_29 = arith.constant 0 : index
    %c0_30 = arith.constant 0 : index
    %31 = vector.load %arg5[%c0_29, %c0_30] : memref<64x128xf32, #tpu.memory_space<vmem>>, vector<64x128xf32>
    %32 = arith.truncf %31 : vector<64x128xf32> to vector<64x128xbf16>
    %cst_31 = arith.constant dense<0.000000e+00> : vector<64x128xf32>
    %33 = tpu.matmul %0, %32, %cst_31 {dimension_numbers = #tpu.dot_dimension_numbers<[1], [0], [0], [1], [0, 0, 1, 1], [], []>} : vector<64x64xbf16>, vector<64x128xbf16>, vector<64x128xf32> -> vector<64x128xf32>
    %34 = arith.truncf %33 : vector<64x128xf32> to vector<64x128xbf16>
    %c2 = arith.constant 2 : index
    %c0_32 = arith.constant 0 : index
    %c0_33 = arith.constant 0 : index
    %35 = vector.load %arg2[%c2, %c0_32, %c0_33] : memref<3x128x128xbf16, #tpu.memory_space<vmem>>, vector<1x128x128xbf16>
    %36 = vector.shape_cast %35 : vector<1x128x128xbf16> to vector<128x128xbf16>
    %cst_34 = arith.constant dense<0.000000e+00> : vector<64x128xf32>
    %37 = tpu.matmul %34, %36, %cst_34 {dimension_numbers = #tpu.dot_dimension_numbers<[1], [0], [0], [1], [0, 0, 1, 1], [], []>} : vector<64x128xbf16>, vector<128x128xbf16>, vector<64x128xf32> -> vector<64x128xf32>
    %c2_35 = arith.constant 2 : index
    %c0_36 = arith.constant 0 : index
    %c0_37 = arith.constant 0 : index
    %38 = vector.load %arg3[%c2_35, %c0_36, %c0_37] : memref<3x1x128xf32, #tpu.memory_space<vmem>>, vector<1x1x128xf32>
    %39 = vector.shape_cast %38 : vector<1x1x128xf32> to vector<1x128xf32>
    %40 = vector.broadcast %39 : vector<1x128xf32> to vector<64x128xf32>
    %41 = arith.addf %37, %40 : vector<64x128xf32>
    %cst_38 = arith.constant 0.000000e+00 : f32
    %42 = vector.broadcast %cst_38 : f32 to vector<64x128xf32>
    %43 = arith.maximumf %41, %42 : vector<64x128xf32>
    %c0_39 = arith.constant 0 : index
    %c0_40 = arith.constant 0 : index
    %44 = vector.load %arg5[%c0_39, %c0_40] : memref<64x128xf32, #tpu.memory_space<vmem>>, vector<64x128xf32>
    tpu.vector_store %arg5[%c0_39, %c0_40], %43 {strides = array<i32>} : memref<64x128xf32, #tpu.memory_space<vmem>>, vector<64x128xf32>,
    %c0_41 = arith.constant 0 : index
    %c0_42 = arith.constant 0 : index
    %45 = vector.load %arg5[%c0_41, %c0_42] : memref<64x128xf32, #tpu.memory_space<vmem>>, vector<64x128xf32>
    %c0_43 = arith.constant 0 : index
    %c0_44 = arith.constant 0 : index
    %46 = vector.load %arg4[%c0_43, %c0_44] : memref<64x128xf32, #tpu.memory_space<vmem>>, vector<64x128xf32>
    tpu.vector_store %arg4[%c0_43, %c0_44], %45 {strides = array<i32>} : memref<64x128xf32, #tpu.memory_space<vmem>>, vector<64x128xf32>,
    return
  }
}

</mosaic_0001>

<bundles_post_ra>
// kernel: gcn_forward.1
= control target key start
LH: loop header
LB: loop body
LE: loop exit
PB: predicated region body
PF: predicated region fallthrough
CT: control target
= control target key end

     0   :  { %vm74_vm0 = vcmask 523264   ;;  %s968_s1 = inlined_call_operand.vmem [shape: f32[64,128], index: 1, kind: input, shape index: {}]   ;;  %s969_s0 = inlined_call_operand.vmem [shape: bf16[64,64], index: 0, kind: input, shape index: {}]   ;;  %s970_s2 = inlined_call_operand.vmem [shape: bf16[3,128,128], index: 2, kind: input, shape index: {}]   ;;  %s971_s3 = inlined_call_operand.vmem [shape: f32[3,1,128], index: 3, kind: input, shape index: {}]   ;;  %s972_s4 = inlined_call_operand.vmem [shape: f32[64,128], index: 4, kind: output, shape index: {}]  }
   0x1   :  { %v32_v0 = vld [vmem:[%s968_s1 + $0x30] sm:$0xff]  ;;  %v33_v1 = vld [vmem:[%s968_s1 + $0x38] sm:$0xff]  ;;  %v30_v2 = vld [vmem:[%s968_s1 + $0x20] sm:$0xff] }
   0x2   :  { %v53_v3 = vpack.c.bf16 %v33_v1, %v32_v0  ;;  %v31_v4 = vld [vmem:[%s968_s1 + $0x28] sm:$0xff]  ;;  %v28_v6 = vld [vmem:[%s968_s1 + $0x10] sm:$0xff]  ;;  %v29_v7 = vld [vmem:[%s968_s1 + $0x18] sm:$0xff] }
   0x3   :  { %v52_v5 = vpack.c.bf16 %v31_v4, %v30_v2  ;;  %v51_v8 = vpack.c.bf16 %v29_v7, %v28_v6  ;;  %v26_v9 = vld [vmem:[%s968_s1] sm:$0xff]  ;;  %v27_v10 = vld [vmem:[%s968_s1 + $0x8] sm:$0xff]  ;;  %v829_v13 = vld [vmem:[%s969_s0 + $0x18] sm:$0xff] }
   0x4   :  { %91 = vmatpush.bf16.msra.mxu1 %v53_v3  ;;  %759 = vmatpush.bf16.msra.mxu3 %v53_v3  ;;  %v50_v11 = vpack.c.bf16 %v27_v10, %v26_v9  ;;  %v822_v12 = vld [vmem:[%s969_s0] sm:$0xff]  ;;  %v742_v14 = vld [vmem:[%s970_s2 + $0x38] sm:$0xff]  ;;  %v741_v15 = vld [vmem:[%s970_s2 + $0x30] sm:$0xff] }
   0x5   :  { %v740_v16 = vld [vmem:[%s970_s2 + $0x28] sm:$0xff]  ;;  %v739_v17 = vld [vmem:[%s970_s2 + $0x20] sm:$0xff]  ;;  %v738_v19 = vld [vmem:[%s970_s2 + $0x18] sm:$0xff] }
   0x6   :  { %v848_v18 = vld [vmem:[%s969_s0 + $0x8] sm:$0xff]  ;;  %v858_v20 = vld [vmem:[%s969_s0 + $0x10] sm:$0xff]  ;;  %v735_v23 = vld [vmem:[%s970_s2] sm:$0xff] }
   0x7   :  { %v737_v21 = vld [vmem:[%s970_s2 + $0x10] sm:$0xff]  ;;  %v736_v22 = vld [vmem:[%s970_s2 + $0x8] sm:$0xff]  ;;  %v767_v43 = vld [vmem:[%s971_s3] ss:$0 sm:$0xff] }
   0x8   :  { %92 = vmatpush.bf16.msra.mxu1 %v52_v5  ;;  %760 = vmatpush.bf16.msra.mxu3 %v52_v5  ;;  %v750_v54 = vld [vmem:[%s970_s2 + $0x78] sm:$0xff]  ;;  %v749_v57 = vld [vmem:[%s970_s2 + $0x70] sm:$0xff]  ;;  %v748_v63 = vld [vmem:[%s970_s2 + $0x68] sm:$0xff] }
   0x9   :  { %v747_v3 = vld [vmem:[%s970_s2 + $0x60] sm:$0xff]  ;;  %v746_v5 = vld [vmem:[%s970_s2 + $0x58] sm:$0xff]  ;;  %v745_v6 = vld [vmem:[%s970_s2 + $0x50] sm:$0xff] }
   0xa   :  { %v744_v7 = vld [vmem:[%s970_s2 + $0x48] sm:$0xff] }
   0xc   :  { %93 = vmatpush.bf16.msra.mxu1 %v51_v8  ;;  %761 = vmatpush.bf16.msra.mxu3 %v51_v8  ;;  %v743_v8 = vld [vmem:[%s970_s2 + $0x40] sm:$0xff] }
  0x10   :  { %94 = vmatpush.bf16.msra.mxu1 %v50_v11  ;;  %762 = vmatpush.bf16.msra.mxu3 %v50_v11 }
  0x13   :  { %589 = vmatmul.msk.bf16.vlgmr.msra.gmra.mxu1 %vm74_vm0, %v822_v12  ;;  %592 = vmatmul.msk.bf16.vlgmr.msra.gmra.mxu3 %vm74_vm0, %v829_v13 }
  0x14   :  { %188 = vmatpush.bf16.msrb.mxu1 %v742_v14  ;;  %348 = vmatpush.bf16.msrb.mxu3 %v750_v54  ;;  %v758_v54 = vld [vmem:[%s970_s2 + $0xb8] sm:$0xff] }
  0x18   :  { %189 = vmatpush.bf16.msrb.mxu1 %v741_v15  ;;  %349 = vmatpush.bf16.msrb.mxu3 %v749_v57  ;;  %v753_v57 = vld [vmem:[%s970_s2 + $0x90] sm:$0xff] }
  0x1c   :  { %190 = vmatpush.bf16.msrb.mxu1 %v740_v16  ;;  %350 = vmatpush.bf16.msrb.mxu3 %v748_v63 }
  0x20   :  { %191 = vmatpush.bf16.msrb.mxu1 %v739_v17  ;;  %351 = vmatpush.bf16.msrb.mxu3 %v747_v3 }
  0x23   :  { %590 = vmatmul.msk.bf16.gmra.mxu1 %vm74_vm0, %v848_v18 }
  0x24   :  { %192 = vmatpush.bf16.msrb.mxu1 %v738_v19  ;;  %352 = vmatpush.bf16.msrb.mxu3 %v746_v5 }
  0x28   :  { %193 = vmatpush.bf16.msrb.mxu1 %v737_v21  ;;  %353 = vmatpush.bf16.msrb.mxu3 %v745_v6  ;;  %v769_v6 = vld [vmem:[%s971_s3 + $0x2] ss:$0 sm:$0xff] }
  0x2c   :  { %194 = vmatpush.bf16.msrb.mxu1 %v736_v22  ;;  %354 = vmatpush.bf16.msrb.mxu3 %v744_v7 }
  0x30   :  { %195 = vmatpush.bf16.msrb.mxu1 %v735_v23  ;;  %355 = vmatpush.bf16.msrb.mxu3 %v743_v8 }
  0x33   :  { %591 = vmatmul.msk.bf16.gmra.mxu1 %vm74_vm0, %v858_v20 }
  0x90   :  { %v96_v24 = vpop.f32.mrf.mxu1 }
  0x96   :  { %v111_v33 = vpop.f32.mrf.mxu3 }
  0x98   :  { %v98_v25 = vpop.f32.mrf.mxu1 }
  0x99   :  { %v116_v26 = vpack.c.bf16 %v98_v25, %v96_v24 }
  0x9b   :  { %196 = vmatmul.bf16.vlgmr.msrb.gmra.mxu1 %v116_v26 }
  0x9e   :  { %v113_v34 = vpop.f32.mrf.mxu3 }
  0x9f   :  { %v119_v35 = vpack.c.bf16 %v113_v34, %v111_v33 }
  0xa0   :  { %v101_v27 = vpop.f32.mrf.mxu1 }
  0xa8   :  { %v103_v28 = vpop.f32.mrf.mxu1 }
  0xa9   :  { %v117_v29 = vpack.c.bf16 %v103_v28, %v101_v27 }
  0xab   :  { %201 = vmatmul.bf16.gmra.mxu1 %v117_v29 }
  0xb0   :  { %v106_v30 = vpop.f32.mrf.mxu1 }
  0xb8   :  { %v108_v31 = vpop.f32.mrf.mxu1 }
  0xb9   :  { %v118_v32 = vpack.c.bf16 %v108_v31, %v106_v30 }
  0xbb   :  { %206 = vmatmul.bf16.gmra.mxu1 %v118_v32  ;;  %v768_v32 = vld [vmem:[%s971_s3 + $0x1] ss:$0 sm:$0xff] }
  0xcb   :  { %211 = vmatmul.bf16.gmra.mxu1 %v119_v35 }
 0x118   :  { %v197_v36 = vpop.f32.mrf.mxu1 }
 0x119   :  { %v198_v61 = vadd.f32 %v767_v43, %v197_v36 }
 0x11b   :  { %v217_v2 = vmax.f32 %v198_v61, 0.0 }
 0x120   :  { %v199_v37 = vpop.f32.mrf.mxu1 }
 0x121   :  { %v200_v58 = vadd.f32 %v767_v43, %v199_v37 }
 0x123   :  { %v218_v0 = vmax.f32 %v200_v58, 0.0  ;;  %v752_v58 = vld [vmem:[%s970_s2 + $0x88] sm:$0xff] }
 0x125   :  { %v241_v4 = vpack.c.bf16 %v218_v0, %v217_v2 }
 0x128   :  { %v202_v38 = vpop.f32.mrf.mxu1 }
 0x129   :  { %v203_v55 = vadd.f32 %v767_v43, %v202_v38 }
 0x12b   :  { %v219_v62 = vmax.f32 %v203_v55, 0.0  ;;  %v757_v55 = vld [vmem:[%s970_s2 + $0xb0] sm:$0xff] }
 0x130   :  { %v204_v39 = vpop.f32.mrf.mxu1 }
 0x131   :  { %v205_v51 = vadd.f32 %v767_v43, %v204_v39 }
 0x133   :  { %v220_v59 = vmax.f32 %v205_v51, 0.0 }
 0x135   :  { %v242_v1 = vpack.c.bf16 %v220_v59, %v219_v62  ;;  %v751_v59 = vld [vmem:[%s970_s2 + $0x80] sm:$0xff] }
 0x138   :  { %v207_v40 = vpop.f32.mrf.mxu1 }
 0x139   :  { %v208_v48 = vadd.f32 %v767_v43, %v207_v40 }
 0x13b   :  { %v221_v56 = vmax.f32 %v208_v48, 0.0 }
 0x140   :  { %v209_v41 = vpop.f32.mrf.mxu1 }
 0x141   :  { %v210_v46 = vadd.f32 %v767_v43, %v209_v41 }
 0x143   :  { %v222_v52 = vmax.f32 %v210_v46, 0.0 }
 0x145   :  { %v243_v60 = vpack.c.bf16 %v222_v52, %v221_v56  ;;  %v756_v56 = vld [vmem:[%s970_s2 + $0xa8] sm:$0xff] }
 0x148   :  { %v212_v42 = vpop.f32.mrf.mxu1 }
 0x149   :  { %v213_v44 = vadd.f32 %v767_v43, %v212_v42 }
 0x14b   :  { %v223_v49 = vmax.f32 %v213_v44, 0.0 }
 0x150   :  { %v214_v45 = vpop.f32.mrf.mxu1 }
 0x151   :  { %v215_v47 = vadd.f32 %v767_v43, %v214_v45 }
 0x153   :  { %v224_v50 = vmax.f32 %v215_v47, 0.0 }
 0x155   :  { %v244_v53 = vpack.c.bf16 %v224_v50, %v223_v49 }
 0x157   :  { %249 = vmatpush.bf16.msra.mxu0 %v244_v53  ;;  %763 = vmatpush.bf16.msra.mxu2 %v244_v53 }
 0x15b   :  { %250 = vmatpush.bf16.msra.mxu0 %v243_v60  ;;  %764 = vmatpush.bf16.msra.mxu2 %v243_v60 }
 0x15f   :  { %251 = vmatpush.bf16.msra.mxu0 %v242_v1  ;;  %765 = vmatpush.bf16.msra.mxu2 %v242_v1 }
 0x163   :  { %252 = vmatpush.bf16.msra.mxu0 %v241_v4  ;;  %766 = vmatpush.bf16.msra.mxu2 %v241_v4 }
 0x166   :  { %625 = vmatmul.msk.bf16.vlgmr.msra.gmra.mxu0 %vm74_vm0, %v822_v12  ;;  %627 = vmatmul.msk.bf16.vlgmr.msra.gmra.mxu2 %vm74_vm0, %v858_v20 }
 0x167   :  { %508 = vmatpush.bf16.msrb.mxu2 %v758_v54 }
 0x16b   :  { %509 = vmatpush.bf16.msrb.mxu2 %v757_v55 }
 0x16f   :  { %510 = vmatpush.bf16.msrb.mxu2 %v756_v56 }
 0x176   :  { %626 = vmatmul.msk.bf16.gmra.mxu0 %vm74_vm0, %v848_v18  ;;  %628 = vmatmul.msk.bf16.gmra.mxu2 %vm74_vm0, %v829_v13 }
 0x1e3   :  { %v254_v9 = vpop.f32.mrf.mxu0 }
 0x1e9   :  { %v264_v16 = vpop.f32.mrf.mxu2 }
 0x1eb   :  { %v256_v10 = vpop.f32.mrf.mxu0 }
 0x1ec   :  { %v274_v11 = vpack.c.bf16 %v256_v10, %v254_v9 }
 0x1ee   :  { %356 = vmatmul.bf16.vlgmr.msrb.gmra.mxu3 %v274_v11 }
 0x1f1   :  { %v266_v19 = vpop.f32.mrf.mxu2 }
 0x1f2   :  { %v276_v21 = vpack.c.bf16 %v266_v19, %v264_v16 }
 0x1f3   :  { %v259_v14 = vpop.f32.mrf.mxu0 }
 0x1f9   :  { %v269_v22 = vpop.f32.mrf.mxu2 }
 0x1fb   :  { %v261_v15 = vpop.f32.mrf.mxu0 }
 0x1fc   :  { %v275_v17 = vpack.c.bf16 %v261_v15, %v259_v14 }
 0x1fe   :  { %361 = vmatmul.bf16.gmra.mxu3 %v275_v17 }
 0x201   :  { %v271_v23 = vpop.f32.mrf.mxu2 }
 0x202   :  { %v277_v24 = vpack.c.bf16 %v271_v23, %v269_v22 }
 0x20e   :  { %366 = vmatmul.bf16.gmra.mxu3 %v276_v21 }
 0x21e   :  { %371 = vmatmul.bf16.gmra.mxu3 %v277_v24 }
 0x271   :  { %v357_v25 = vpop.f32.mrf.mxu3 }
 0x272   :  { %v358_v48 = vadd.f32 %v768_v32, %v357_v25 }
 0x274   :  { %v377_v52 = vmax.f32 %v358_v48, 0.0 }
 0x279   :  { %v359_v26 = vpop.f32.mrf.mxu3 }
 0x27a   :  { %v360_v45 = vadd.f32 %v768_v32, %v359_v26 }
 0x27c   :  { %v378_v50 = vmax.f32 %v360_v45, 0.0 }
 0x27e   :  { %v401_v53 = vpack.c.bf16 %v378_v50, %v377_v52 }
 0x281   :  { %v362_v27 = vpop.f32.mrf.mxu3 }
 0x282   :  { %v363_v43 = vadd.f32 %v768_v32, %v362_v27 }
 0x284   :  { %v379_v49 = vmax.f32 %v363_v43, 0.0 }
 0x289   :  { %v364_v28 = vpop.f32.mrf.mxu3 }
 0x28a   :  { %v365_v40 = vadd.f32 %v768_v32, %v364_v28 }
 0x28c   :  { %v380_v46 = vmax.f32 %v365_v40, 0.0 }
 0x28e   :  { %v402_v51 = vpack.c.bf16 %v380_v46, %v379_v49 }
 0x291   :  { %v367_v29 = vpop.f32.mrf.mxu3 }
 0x292   :  { %v368_v37 = vadd.f32 %v768_v32, %v367_v29 }
 0x294   :  { %v381_v44 = vmax.f32 %v368_v37, 0.0 }
 0x299   :  { %v369_v30 = vpop.f32.mrf.mxu3 }
 0x29a   :  { %v370_v35 = vadd.f32 %v768_v32, %v369_v30 }
 0x29c   :  { %v382_v41 = vmax.f32 %v370_v35, 0.0 }
 0x29e   :  { %v403_v47 = vpack.c.bf16 %v382_v41, %v381_v44 }
 0x2a1   :  { %v372_v31 = vpop.f32.mrf.mxu3 }
 0x2a2   :  { %v373_v33 = vadd.f32 %v768_v32, %v372_v31 }
 0x2a4   :  { %v383_v38 = vmax.f32 %v373_v33, 0.0 }
 0x2a9   :  { %v374_v34 = vpop.f32.mrf.mxu3 }
 0x2aa   :  { %v375_v36 = vadd.f32 %v768_v32, %v374_v34 }
 0x2ac   :  { %v384_v39 = vmax.f32 %v375_v36, 0.0 }
 0x2ae   :  { %v404_v42 = vpack.c.bf16 %v384_v39, %v383_v38 }
 0x2b0   :  { %409 = vmatpush.bf16.msrb.mxu0 %v404_v42 }
 0x2b4   :  { %410 = vmatpush.bf16.msrb.mxu0 %v403_v47 }
 0x2b8   :  { %411 = vmatpush.bf16.msrb.mxu0 %v402_v51 }
 0x2bc   :  { %412 = vmatpush.bf16.msrb.mxu0 %v401_v53 }
 0x2bf   :  { %678 = vmatmul.msk.bf16.vlgmr.msrb.gmra.mxu0 %vm74_vm0, %v822_v12  ;;  %v755_v12 = vld [vmem:[%s970_s2 + $0xa0] sm:$0xff] }
 0x2c0   :  { %511 = vmatpush.bf16.msrb.mxu2 %v755_v12 }
 0x2cf   :  { %679 = vmatmul.msk.bf16.gmra.mxu0 %vm74_vm0, %v848_v18  ;;  %v754_v18 = vld [vmem:[%s970_s2 + $0x98] sm:$0xff] }
 0x2d0   :  { %512 = vmatpush.bf16.msrb.mxu2 %v754_v18 }
 0x2d4   :  { %513 = vmatpush.bf16.msrb.mxu2 %v753_v57 }
 0x2d8   :  { %514 = vmatpush.bf16.msrb.mxu2 %v752_v58 }
 0x2dc   :  { %515 = vmatpush.bf16.msrb.mxu2 %v751_v59 }
 0x2df   :  { %680 = vmatmul.msk.bf16.gmra.mxu0 %vm74_vm0, %v858_v20 }
 0x2ef   :  { %681 = vmatmul.msk.bf16.gmra.mxu0 %vm74_vm0, %v829_v13 }
 0x33c   :  { %v414_v20 = vpop.f32.mrf.mxu0 }
 0x344   :  { %v416_v60 = vpop.f32.mrf.mxu0 }
 0x345   :  { %v434_v61 = vpack.c.bf16 %v416_v60, %v414_v20 }
 0x347   :  { %516 = vmatmul.bf16.vlgmr.msrb.gmra.mxu2 %v434_v61 }
 0x34c   :  { %v419_v13 = vpop.f32.mrf.mxu0 }
 0x354   :  { %v421_v62 = vpop.f32.mrf.mxu0 }
 0x355   :  { %v435_v63 = vpack.c.bf16 %v421_v62, %v419_v13 }
 0x357   :  { %521 = vmatmul.bf16.gmra.mxu2 %v435_v63 }
 0x35c   :  { %v424_v0 = vpop.f32.mrf.mxu0 }
 0x364   :  { %v426_v1 = vpop.f32.mrf.mxu0 }
 0x365   :  { %v436_v2 = vpack.c.bf16 %v426_v1, %v424_v0 }
 0x367   :  { %526 = vmatmul.bf16.gmra.mxu2 %v436_v2 }
 0x36c   :  { %v429_v3 = vpop.f32.mrf.mxu0 }
 0x374   :  { %v431_v4 = vpop.f32.mrf.mxu0 }
 0x375   :  { %v437_v5 = vpack.c.bf16 %v431_v4, %v429_v3 }
 0x377   :  { %531 = vmatmul.bf16.gmra.mxu2 %v437_v5 }
 0x3ca   :  { %v517_v7 = vpop.f32.mrf.mxu2 }
 0x3cb   :  { %v518_v8 = vadd.f32 %v769_v6, %v517_v7 }
 0x3cd   :  { %v537_v9 = vmax.f32 %v518_v8, 0.0 }
 0x3cf   :  { %561 = vst [vmem:[%s972_s4] sm:$0xff] %v537_v9 }
 0x3d2   :  { %v519_v10 = vpop.f32.mrf.mxu2 }
 0x3d3   :  { %v520_v11 = vadd.f32 %v769_v6, %v519_v10 }
 0x3d5   :  { %v538_v14 = vmax.f32 %v520_v11, 0.0 }
 0x3d7   :  { %562 = vst [vmem:[%s972_s4 + $0x8] sm:$0xff] %v538_v14 }
 0x3da   :  { %v522_v15 = vpop.f32.mrf.mxu2 }
 0x3db   :  { %v523_v16 = vadd.f32 %v769_v6, %v522_v15 }
 0x3dd   :  { %v539_v17 = vmax.f32 %v523_v16, 0.0 }
 0x3df   :  { %563 = vst [vmem:[%s972_s4 + $0x10] sm:$0xff] %v539_v17 }
 0x3e2   :  { %v524_v19 = vpop.f32.mrf.mxu2 }
 0x3e3   :  { %v525_v21 = vadd.f32 %v769_v6, %v524_v19 }
 0x3e5   :  { %v540_v22 = vmax.f32 %v525_v21, 0.0 }
 0x3e7   :  { %564 = vst [vmem:[%s972_s4 + $0x18] sm:$0xff] %v540_v22 }
 0x3ea   :  { %v527_v23 = vpop.f32.mrf.mxu2 }
 0x3eb   :  { %v528_v24 = vadd.f32 %v769_v6, %v527_v23 }
 0x3ed   :  { %v541_v25 = vmax.f32 %v528_v24, 0.0 }
 0x3ef   :  { %565 = vst [vmem:[%s972_s4 + $0x20] sm:$0xff] %v541_v25 }
 0x3f2   :  { %v529_v26 = vpop.f32.mrf.mxu2 }
 0x3f3   :  { %v530_v27 = vadd.f32 %v769_v6, %v529_v26 }
 0x3f5   :  { %v542_v28 = vmax.f32 %v530_v27, 0.0 }
 0x3f7   :  { %566 = vst [vmem:[%s972_s4 + $0x28] sm:$0xff] %v542_v28 }
 0x3fa   :  { %v532_v29 = vpop.f32.mrf.mxu2 }
 0x3fb   :  { %v533_v30 = vadd.f32 %v769_v6, %v532_v29 }
 0x3fd   :  { %v543_v31 = vmax.f32 %v533_v30, 0.0 }
 0x3ff   :  { %567 = vst [vmem:[%s972_s4 + $0x30] sm:$0xff] %v543_v31 }
 0x402   :  { %v534_v32 = vpop.f32.mrf.mxu2 }
 0x403   :  { %v535_v33 = vadd.f32 %v769_v6, %v534_v32 }
 0x405   :  { %v544_v34 = vmax.f32 %v535_v33, 0.0 }
 0x407   :  { %568 = vst [vmem:[%s972_s4 + $0x38] sm:$0xff] %v544_v34 }

</bundles_post_ra>
